<compile_context>
chip_gen: v7x
topology: tpu7x:2x2x1
jax: 0.10.0
libtpu: 0.0.40
codegen_flags: <defaults>
</compile_context>

<pallas_src>
import functools

import jax
import jax.numpy as jnp
from jax.experimental import pallas as pl
from jax.experimental.pallas import tpu as pltpu


def _round_up(x: int, m: int) -> int:
    return ((x + m - 1) // m) * m


def _softplus(x):
    # PyTorch Softplus(beta=1, threshold=20): identity above the threshold,
    # log1p(exp(x)) below.  exp may overflow to +inf for very large x, but
    # log1p(inf) = inf and the where() selects x there, so no NaNs appear.
    thresh = jnp.asarray(20.0, dtype=x.dtype)
    return jnp.where(x > thresh, x, jnp.log1p(jnp.exp(x)))


def dense_regression_kernel(x_ref, wh_ref, scale_ref, shift_ref,
                            wout_ref, bout_ref, out_ref, *, act_in_bf16):
    """Fused MLP tile kernel.

    x_ref     : (TM, F)      input row tile (MXU operand dtype)
    wh_ref    : (L, F, F)    stacked hidden-layer weights (x @ W convention)
    scale_ref : (L, 1, F)    folded BN scale  = gamma / sqrt(var + eps)  (f32)
    shift_ref : (L, 1, F)    folded BN shift  = (b - mean) * scale + beta (f32)
    wout_ref  : (F, O_out)   output projection weight
    bout_ref  : (1, O_out)   output projection bias (f32)
    out_ref   : (TM, O_out)  output tile
    """
    mm_dtype = x_ref.dtype
    h = x_ref[...]
    num_hidden = wh_ref.shape[0]
    for l in range(num_hidden):               # small, fixed-depth static loop
        z = jnp.dot(h, wh_ref[l], preferred_element_type=jnp.float32)
        z = z * scale_ref[l] + shift_ref[l]   # BN affine in f32
        if act_in_bf16:
            # v6e/v7x EUP handles packed bf16; the result feeds a bf16 matmul
            # anyway, so cast before the two transcendentals (exp + log1p).
            h = _softplus(z.astype(jnp.bfloat16))
        else:
            h = _softplus(z).astype(mm_dtype)
    out = jnp.dot(h, wout_ref[...], preferred_element_type=jnp.float32)
    out_ref[...] = (out + bout_ref[...]).astype(out_ref.dtype)


def _device_info():
    """(is_v7x, bf16_eup_supported, physical VMEM bytes per TensorCore)."""
    kind = ""
    try:
        dev = jax.devices()[0]
        if dev.platform == "tpu":
            kind = dev.device_kind.lower()
    except Exception:
        pass
    is_v7 = "v7" in kind
    is_v6 = "v6" in kind
    bf16_eup = is_v6 or is_v7                 # v5e EUP has no bf16
    try:
        vmem_phys = int(pltpu.get_tpu_info().vmem_capacity_bytes)
    except Exception:
        vmem_phys = (64 << 20) if is_v7 else (128 << 20)
    return is_v7, bf16_eup, vmem_phys


def _vmem_tile_bytes(shape, dtype):
    """VMEM footprint of one tile after lane(128)/sublane rounding."""
    isz = jnp.dtype(dtype).itemsize
    dims = [int(d) for d in shape]
    if len(dims) >= 1:
        dims[-1] = _round_up(dims[-1], 128)
    if len(dims) >= 2:
        dims[-2] = _round_up(dims[-2], (8 * 4) // isz)   # f32:8, bf16:16 rows
    n = 1
    for d in dims:
        n *= d
    return n * isz


def dense_regression(x, wh, scale, shift, wout, bout, *,
                     tile_m=4096, use_bf16=True, lane_dense_output=None,
                     out_dtype=jnp.float32):
    """Runs the fused denseRegression forward pass.

    x     : (N, F)     node features
    wh    : (L, F, F)  hidden Linear weights, stored for x @ W
    scale : (L, F)     folded BN scale
    shift : (L, F)     folded BN shift (includes the Linear bias)
    wout  : (F, O)     output Linear weight (x @ W)
    bout  : (1, O)     output Linear bias

    use_bf16=True casts matmul operands / inter-layer activations to bf16
    (f32 accumulation); pass False for an all-f32, accuracy-first path.
    """
    N, F = x.shape
    L = int(wh.shape[0])
    O = int(wout.shape[1])

    is_v7, bf16_eup, vmem_phys = _device_info()

    # ---- output layout: lane-dense (pad O to 128) only when the padding does
    #      not blow up HBM writeback; otherwise store the real O columns
    #      (block last dim == full array dim, so the BlockSpec is still legal). ----
    O_pad = _round_up(O, 128)
    if lane_dense_output is None:
        lane_dense_output = (O_pad <= 2 * O)
    if lane_dense_output:
        O_out = O_pad
        if O_pad != O:
            wout = jnp.pad(wout, ((0, 0), (0, O_pad - O)))
            bout = jnp.pad(bout, ((0, 0), (0, O_pad - O)))
    else:
        O_out = O

    # ---- MXU-friendly operand dtype (bf16 matmul, f32 accumulate) ----
    mm_dtype = jnp.bfloat16 if use_bf16 else jnp.float32
    act_in_bf16 = bool(use_bf16 and bf16_eup)
    x_in = x.astype(mm_dtype)
    wh_in = wh.astype(mm_dtype)
    wout_in = wout.astype(mm_dtype)
    scale_in = scale.reshape(L, 1, F).astype(jnp.float32)
    shift_in = shift.reshape(L, 1, F).astype(jnp.float32)
    bout_in = bout.astype(jnp.float32)

    # ---- row tile: as large as VMEM allows (amortize per-step overhead).
    #      Only v7x has 2 TensorCores, so only there shrink to guarantee >= 2
    #      grid steps for the "parallel" axis. ----
    row_align = 16 if use_bf16 else 8
    if is_v7 and N >= 2 * row_align:
        tm_cap = _round_up(pl.cdiv(N, 2), row_align)
    else:
        tm_cap = _round_up(N, row_align)
    tm = max(row_align, min(int(tile_m), tm_cap))

    # ---- generation-aware VMEM budget from lane/sublane-rounded shapes ----
    vmem_cap = max(min(int(0.8 * vmem_phys), vmem_phys - (12 << 20)), 16 << 20)
    const_bytes = (_vmem_tile_bytes((L, F, F), mm_dtype)
                   + _vmem_tile_bytes((F, O_out), mm_dtype)
                   + 2 * _vmem_tile_bytes((L, 1, F), jnp.float32)
                   + _vmem_tile_bytes((1, O_out), jnp.float32))

    def _budget(tm_, const_bufs):
        return (2 * _vmem_tile_bytes((tm_, F), mm_dtype)       # x tiles (dbl buf)
                + 2 * _vmem_tile_bytes((tm_, O_out), out_dtype)  # out tiles
                + const_bufs * const_bytes)                    # resident weights

    while tm > row_align and _budget(tm, 2) > vmem_cap:
        tm = max(row_align, _round_up(tm // 2, row_align))

    N_pad = _round_up(N, tm)
    if N_pad != N:
        x_in = jnp.pad(x_in, ((0, N_pad - N), (0, 0)))
    grid = (N_pad // tm,)

    # ---- cost estimate: documents the roofline, helps XLA schedule the
    #      surrounding pads/casts/slice around the custom call ----
    isz = jnp.dtype(mm_dtype).itemsize
    cost = pl.CostEstimate(
        flops=2 * N_pad * F * (L * F + O_out),
        transcendentals=2 * L * N_pad * F,           # exp + log1p per hidden elem
        bytes_accessed=(N_pad * F * isz + L * F * F * isz + F * O_out * isz
                        + 2 * L * F * 4 + O_out * 4
                        + N_pad * O_out * jnp.dtype(out_dtype).itemsize),
    )

    kernel = functools.partial(dense_regression_kernel, act_in_bf16=act_in_bf16)

    def _call(use_buffered):
        const_bufs = 1 if use_buffered else 2
        ckw = dict(pipeline_mode=pl.Buffered(1)) if use_buffered else {}
        grid_spec = pl.GridSpec(
            grid=grid,
            in_specs=[
                pl.BlockSpec((tm, F), lambda i: (i, 0)),                 # x tile
                pl.BlockSpec((L, F, F), lambda i: (0, 0, 0), **ckw),     # wh
                pl.BlockSpec((L, 1, F), lambda i: (0, 0, 0), **ckw),     # scale
                pl.BlockSpec((L, 1, F), lambda i: (0, 0, 0), **ckw),     # shift
                pl.BlockSpec((F, O_out), lambda i: (0, 0), **ckw),       # wout
                pl.BlockSpec((1, O_out), lambda i: (0, 0), **ckw),       # bout
            ],
            out_specs=pl.BlockSpec((tm, O_out), lambda i: (i, 0)),
        )
        vmem_limit = int(min(vmem_cap,
                             max(_budget(tm, const_bufs) + (4 << 20), 16 << 20)))
        return pl.pallas_call(
            kernel,
            out_shape=jax.ShapeDtypeStruct((N_pad, O_out), out_dtype),
            grid_spec=grid_spec,
            compiler_params=pltpu.CompilerParams(
                dimension_semantics=("parallel",),
                vmem_limit_bytes=vmem_limit),
            cost_estimate=cost,
        )(x_in, wh_in, scale_in, shift_in, wout_in, bout_in)

    # Grid-invariant operands: single-buffer them (1x resident weight VMEM).
    # Fall back to default double-buffering ONLY for pipeline_mode/Buffered
    # related errors; OOM / genuine lowering failures propagate.
    try:
        out_padded = _call(use_buffered=hasattr(pl, "Buffered"))
    except (TypeError, NotImplementedError, ValueError,
            pltpu.LoweringException) as e:
        msg = str(e).lower()
        if ("pipeline" not in msg) and ("buffer" not in msg):
            raise
        out_padded = _call(use_buffered=False)

    return out_padded[:N, :O]


def make_params(key, in_features, out_features, n_h):
    """Deterministic synthetic parameters matching the PyTorch module shapes."""
    L = n_h - 1
    keys = jax.random.split(key, 2 * L + 6)
    eps = 1e-5
    lim = 1.0 / jnp.sqrt(in_features)

    # hidden Linear(F, F) weights (stored transposed for x @ W) + biases
    wh, bh = [], []
    for l in range(L):
        w = jax.random.uniform(keys[2 * l], (in_features, in_features),
                               minval=-lim, maxval=lim, dtype=jnp.float32)
        b = jax.random.uniform(keys[2 * l + 1], (in_features,),
                               minval=-lim, maxval=lim, dtype=jnp.float32)
        wh.append(w)
        bh.append(b)
    wh = jnp.stack(wh)          # (L, F, F)
    bh = jnp.stack(bh)          # (L, F)

    # BatchNorm1d params (inference mode): gamma, beta, running_mean, running_var
    gamma = 1.0 + 0.1 * jax.random.normal(keys[2 * L], (L, in_features), jnp.float32)
    beta = 0.1 * jax.random.normal(keys[2 * L + 1], (L, in_features), jnp.float32)
    running_mean = 0.05 * jax.random.normal(keys[2 * L + 2], (L, in_features), jnp.float32)
    running_var = jnp.abs(1.0 + 0.1 * jax.random.normal(
        keys[2 * L + 3], (L, in_features), jnp.float32))

    # Fold Linear bias + BN into a per-feature affine:
    #   BN(xW + b) = (xW) * s + ((b - mean) * s + beta),  s = gamma / sqrt(var + eps)
    scale = gamma / jnp.sqrt(running_var + eps)            # (L, F)
    shift = (bh - running_mean) * scale + beta             # (L, F)

    # fc_out : Linear(F, O)
    wout = jax.random.uniform(keys[2 * L + 4], (in_features, out_features),
                              minval=-lim, maxval=lim, dtype=jnp.float32)
    bout = jax.random.uniform(keys[2 * L + 5], (1, out_features),
                              minval=-lim, maxval=lim, dtype=jnp.float32)
    return wh, scale, shift, wout, bout


def reference(x, wh, scale, shift, wout, bout):
    """Pure-JAX f32 reference of the module forward (inference-mode BN)."""
    h = x.astype(jnp.float32)
    for l in range(wh.shape[0]):
        h = jax.nn.softplus((h @ wh[l]) * scale[l][None, :] + shift[l][None, :])
    return h @ wout + bout


if __name__ == "__main__":
    # Small shapes consistent with the module: N nodes, in_features, out_features.
    N, F, O, n_h = 64, 32, 8, 3

    key = jax.random.PRNGKey(0)
    kx, kp = jax.random.split(key)
    x = jax.random.normal(kx, (N, F), dtype=jnp.float32)
    wh, scale, shift, wout, bout = make_params(kp, F, O, n_h)

    out = dense_regression(x, wh, scale, shift, wout, bout)
    out = jax.block_until_ready(out)

    ref = reference(x, wh, scale, shift, wout, bout)
    assert out.shape == (N, O)
    # bf16 MXU operands / bf16 softplus -> compare against f32 reference with a
    # loose tolerance.  (use_bf16=False gives an all-f32 path for tight checks.)
    max_err = float(jnp.max(jnp.abs(out - ref)))
    assert jnp.allclose(out, ref, atol=5e-2, rtol=5e-2), (
        f"mismatch vs JAX reference (max abs err = {max_err})")

    print("KERNEL_OK")
</pallas_src>

<mosaic_0001>
module attributes {stable_mosaic.version = 11 : i64} {
  func.func @dense_regression_kernel(%arg0: i32, %arg1: memref<64x32xbf16, #tpu.memory_space<vmem>>, %arg2: memref<2x32x32xbf16, #tpu.memory_space<vmem>>, %arg3: memref<2x1x32xf32, #tpu.memory_space<vmem>>, %arg4: memref<2x1x32xf32, #tpu.memory_space<vmem>>, %arg5: memref<32x8xbf16, #tpu.memory_space<vmem>>, %arg6: memref<1x8xf32, #tpu.memory_space<vmem>>, %arg7: memref<64x8xf32, #tpu.memory_space<vmem>>) attributes {dimension_semantics = [#tpu.dimension_semantics<parallel>], iteration_bounds = array<i64: 1>, scalar_prefetch = 0 : i64, scratch_operands = 0 : i64, tpu.core_type = #tpu.core_type<tc>, window_params = [{transform_indices = @transform_0, window_bounds = array<i64: 64, 32>}, {pipeline_mode = #tpu.pipeline_mode<synchronous>, transform_indices = @transform_1, window_bounds = array<i64: 2, 32, 32>}, {pipeline_mode = #tpu.pipeline_mode<synchronous>, transform_indices = @transform_2, window_bounds = array<i64: 2, 1, 32>}, {pipeline_mode = #tpu.pipeline_mode<synchronous>, transform_indices = @transform_3, window_bounds = array<i64: 2, 1, 32>}, {pipeline_mode = #tpu.pipeline_mode<synchronous>, transform_indices = @transform_4, window_bounds = array<i64: 32, 8>}, {pipeline_mode = #tpu.pipeline_mode<synchronous>, transform_indices = @transform_5, window_bounds = array<i64: 1, 8>}, {transform_indices = @transform_6, window_bounds = array<i64: 64, 8>}]} {
    %c0 = arith.constant 0 : index
    %c0_0 = arith.constant 0 : index
    %0 = vector.load %arg1[%c0, %c0_0] : memref<64x32xbf16, #tpu.memory_space<vmem>>, vector<64x32xbf16>
    %c0_1 = arith.constant 0 : index
    %c0_2 = arith.constant 0 : index
    %c0_3 = arith.constant 0 : index
    %1 = vector.load %arg2[%c0_1, %c0_2, %c0_3] : memref<2x32x32xbf16, #tpu.memory_space<vmem>>, vector<1x32x32xbf16>
    %2 = vector.shape_cast %1 : vector<1x32x32xbf16> to vector<32x32xbf16>
    %cst = arith.constant dense<0.000000e+00> : vector<64x32xf32>
    %3 = tpu.matmul %0, %2, %cst {dimension_numbers = #tpu.dot_dimension_numbers<[1], [0], [0], [1], [0, 0, 1, 1], [], []>} : vector<64x32xbf16>, vector<32x32xbf16>, vector<64x32xf32> -> vector<64x32xf32>
    %c0_4 = arith.constant 0 : index
    %c0_5 = arith.constant 0 : index
    %c0_6 = arith.constant 0 : index
    %4 = vector.load %arg3[%c0_4, %c0_5, %c0_6] : memref<2x1x32xf32, #tpu.memory_space<vmem>>, vector<1x1x32xf32>
    %5 = vector.shape_cast %4 : vector<1x1x32xf32> to vector<1x32xf32>
    %6 = vector.broadcast %5 : vector<1x32xf32> to vector<64x32xf32>
    %7 = arith.mulf %3, %6 : vector<64x32xf32>
    %c0_7 = arith.constant 0 : index
    %c0_8 = arith.constant 0 : index
    %c0_9 = arith.constant 0 : index
    %8 = vector.load %arg4[%c0_7, %c0_8, %c0_9] : memref<2x1x32xf32, #tpu.memory_space<vmem>>, vector<1x1x32xf32>
    %9 = vector.shape_cast %8 : vector<1x1x32xf32> to vector<1x32xf32>
    %10 = vector.broadcast %9 : vector<1x32xf32> to vector<64x32xf32>
    %11 = arith.addf %7, %10 : vector<64x32xf32>
    %cst_10 = arith.constant 2.000000e+01 : f32
    %12 = vector.broadcast %cst_10 : f32 to vector<64x32xf32>
    %13 = arith.cmpf ogt, %11, %12 : vector<64x32xf32>
    %14 = math.exp %11 : vector<64x32xf32>
    %15 = math.log1p %14 : vector<64x32xf32>
    %16 = arith.select %13, %11, %15 : vector<64x32xi1>, vector<64x32xf32>
    %17 = arith.truncf %16 : vector<64x32xf32> to vector<64x32xbf16>
    %c1 = arith.constant 1 : index
    %c0_11 = arith.constant 0 : index
    %c0_12 = arith.constant 0 : index
    %18 = vector.load %arg2[%c1, %c0_11, %c0_12] : memref<2x32x32xbf16, #tpu.memory_space<vmem>>, vector<1x32x32xbf16>
    %19 = vector.shape_cast %18 : vector<1x32x32xbf16> to vector<32x32xbf16>
    %cst_13 = arith.constant dense<0.000000e+00> : vector<64x32xf32>
    %20 = tpu.matmul %17, %19, %cst_13 {dimension_numbers = #tpu.dot_dimension_numbers<[1], [0], [0], [1], [0, 0, 1, 1], [], []>} : vector<64x32xbf16>, vector<32x32xbf16>, vector<64x32xf32> -> vector<64x32xf32>
    %c1_14 = arith.constant 1 : index
    %c0_15 = arith.constant 0 : index
    %c0_16 = arith.constant 0 : index
    %21 = vector.load %arg3[%c1_14, %c0_15, %c0_16] : memref<2x1x32xf32, #tpu.memory_space<vmem>>, vector<1x1x32xf32>
    %22 = vector.shape_cast %21 : vector<1x1x32xf32> to vector<1x32xf32>
    %23 = vector.broadcast %22 : vector<1x32xf32> to vector<64x32xf32>
    %24 = arith.mulf %20, %23 : vector<64x32xf32>
    %c1_17 = arith.constant 1 : index
    %c0_18 = arith.constant 0 : index
    %c0_19 = arith.constant 0 : index
    %25 = vector.load %arg4[%c1_17, %c0_18, %c0_19] : memref<2x1x32xf32, #tpu.memory_space<vmem>>, vector<1x1x32xf32>
    %26 = vector.shape_cast %25 : vector<1x1x32xf32> to vector<1x32xf32>
    %27 = vector.broadcast %26 : vector<1x32xf32> to vector<64x32xf32>
    %28 = arith.addf %24, %27 : vector<64x32xf32>
    %cst_20 = arith.constant 2.000000e+01 : f32
    %29 = vector.broadcast %cst_20 : f32 to vector<64x32xf32>
    %30 = arith.cmpf ogt, %28, %29 : vector<64x32xf32>
    %31 = math.exp %28 : vector<64x32xf32>
    %32 = math.log1p %31 : vector<64x32xf32>
    %33 = arith.select %30, %28, %32 : vector<64x32xi1>, vector<64x32xf32>
    %34 = arith.truncf %33 : vector<64x32xf32> to vector<64x32xbf16>
    %c0_21 = arith.constant 0 : index
    %c0_22 = arith.constant 0 : index
    %35 = vector.load %arg5[%c0_21, %c0_22] : memref<32x8xbf16, #tpu.memory_space<vmem>>, vector<32x8xbf16>
    %cst_23 = arith.constant dense<0.000000e+00> : vector<64x8xf32>
    %36 = tpu.matmul %34, %35, %cst_23 {dimension_numbers = #tpu.dot_dimension_numbers<[1], [0], [0], [1], [0, 0, 1, 1], [], []>} : vector<64x32xbf16>, vector<32x8xbf16>, vector<64x8xf32> -> vector<64x8xf32>
    %c0_24 = arith.constant 0 : index
    %c0_25 = arith.constant 0 : index
    %37 = vector.load %arg6[%c0_24, %c0_25] : memref<1x8xf32, #tpu.memory_space<vmem>>, vector<1x8xf32>
    %38 = vector.broadcast %37 : vector<1x8xf32> to vector<64x8xf32>
    %39 = arith.addf %36, %38 : vector<64x8xf32>
    %c0_26 = arith.constant 0 : index
    %c0_27 = arith.constant 0 : index
    %40 = vector.load %arg7[%c0_26, %c0_27] : memref<64x8xf32, #tpu.memory_space<vmem>>, vector<64x8xf32>
    tpu.vector_store %arg7[%c0_26, %c0_27], %39 {strides = array<i32>} : memref<64x8xf32, #tpu.memory_space<vmem>>, vector<64x8xf32>,
    return
  }
  func.func @transform_0(%arg0: i32) -> (i32, i32) {
    %c0_i32 = arith.constant 0 : i32
    %c0_i32_0 = arith.constant 0 : i32
    return %arg0, %c0_i32 : i32, i32
  }
  func.func @transform_1(%arg0: i32) -> (i32, i32, i32) {
    %c0_i32 = arith.constant 0 : i32
    %c0_i32_0 = arith.constant 0 : i32
    %c0_i32_1 = arith.constant 0 : i32
    %c0_i32_2 = arith.constant 0 : i32
    return %c0_i32, %c0_i32_0, %c0_i32_1 : i32, i32, i32
  }
  func.func @transform_2(%arg0: i32) -> (i32, i32, i32) {
    %c0_i32 = arith.constant 0 : i32
    %c0_i32_0 = arith.constant 0 : i32
    %c0_i32_1 = arith.constant 0 : i32
    %c0_i32_2 = arith.constant 0 : i32
    return %c0_i32, %c0_i32_0, %c0_i32_1 : i32, i32, i32
  }
  func.func @transform_3(%arg0: i32) -> (i32, i32, i32) {
    %c0_i32 = arith.constant 0 : i32
    %c0_i32_0 = arith.constant 0 : i32
    %c0_i32_1 = arith.constant 0 : i32
    %c0_i32_2 = arith.constant 0 : i32
    return %c0_i32, %c0_i32_0, %c0_i32_1 : i32, i32, i32
  }
  func.func @transform_4(%arg0: i32) -> (i32, i32) {
    %c0_i32 = arith.constant 0 : i32
    %c0_i32_0 = arith.constant 0 : i32
    %c0_i32_1 = arith.constant 0 : i32
    return %c0_i32, %c0_i32_0 : i32, i32
  }
  func.func @transform_5(%arg0: i32) -> (i32, i32) {
    %c0_i32 = arith.constant 0 : i32
    %c0_i32_0 = arith.constant 0 : i32
    %c0_i32_1 = arith.constant 0 : i32
    return %c0_i32, %c0_i32_0 : i32, i32
  }
  func.func @transform_6(%arg0: i32) -> (i32, i32) {
    %c0_i32 = arith.constant 0 : i32
    %c0_i32_0 = arith.constant 0 : i32
    return %arg0, %c0_i32 : i32, i32
  }
}

</mosaic_0001>

<bundles_post_ra>
// kernel: tpu_custom_call.1
= control target key start
LH: loop header
LB: loop body
LE: loop exit
PB: predicated region body
PF: predicated region fallthrough
CT: control target
= control target key end

     0   :  { %vm68_vm0 = vcmask 261120   ;;  %s1128_s1 = inlined_call_operand.vmem [shape: bf16[2,32,32], index: 1, kind: input, shape index: {}]   ;;  %s1129_s0 = inlined_call_operand.vmem [shape: bf16[64,32], index: 0, kind: input, shape index: {}]   ;;  %s1130_s2 = inlined_call_operand.vmem [shape: f32[2,1,32], index: 2, kind: input, shape index: {}]   ;;  %s1131_s3 = inlined_call_operand.vmem [shape: f32[2,1,32], index: 3, kind: input, shape index: {}]   ;;  %s1132_s4 = inlined_call_operand.vmem [shape: bf16[32,8], index: 4, kind: input, shape index: {}]   ;;  %s1133_s5 = inlined_call_operand.vmem [shape: f32[1,8], index: 5, kind: input, shape index: {}]   ;;  %s1134_s6 = inlined_call_operand.vmem [shape: f32[64,8], index: 6, kind: output, shape index: {}]  }
   0x1   :  { %v722_v0 = vld [vmem:[%s1128_s1] sm:$0xff]   ;;  %v723_v1 = vld [vmem:[%s1128_s1 + $0x8] sm:$0xff]   ;;  %v725_v3 = vld [vmem:[%s1129_s0 + $0x10] sm:$0xff]  }
   0x2   :  { %682 = vmatprep.subr.bf16.mxu0 %v722_v0  ;;  %718 = vmatprep.subr.bf16.mxu1 %v722_v0  ;;  %v724_v2 = vld [vmem:[%s1129_s0] sm:$0xff]   ;;  %v726_v4 = vld [vmem:[%s1129_s0 + $0x8] sm:$0xff]   ;;  %v727_v5 = vld [vmem:[%s1129_s0 + $0x18] sm:$0xff]  }
   0x3   :  { %683 = vmatpush3.bf16.msra.mxu0 %v722_v0  ;;  %720 = vmatpush3.bf16.msra.mxu1 %v722_v0  ;;  %v728_v6 = vld [vmem:[%s1128_s1 + $0x10] sm:$0xff]   ;;  %v729_v7 = vld [vmem:[%s1128_s1 + $0x18] sm:$0xff]   ;;  %v641_v8 = vld [vmem:[%s1130_s2] ss:$0 sm:$0xff] }
   0x4   :  { %684 = vmatprep.subr.bf16.mxu0 %v723_v1  ;;  %719 = vmatprep.subr.bf16.mxu1 %v723_v1  ;;  %v642_v10 = vld [vmem:[%s1131_s3] ss:$0 sm:$0xff] }
   0x5   :  { %686 = vmatprep.mubr.msk.bf16.mxu0 %vm68_vm0, %v724_v2  ;;  %690 = vmatprep.mubr.msk.bf16.mxu1 %vm68_vm0, %v725_v3 }
   0x7   :  { %685 = vmatpush3.bf16.msra.mxu0 %v723_v1  ;;  %721 = vmatpush3.bf16.msra.mxu1 %v723_v1 }
   0x8   :  { %694 = vmatprep.subr.bf16.mxu1 %v728_v6 }
   0xa   :  { %687 = vmatmul.mubr.msk.bf16.vlgmr.msra.gmra.mrb[0].mxu0 %vm68_vm0, %v726_v4  ;;  %691 = vmatmul.mubr.msk.bf16.vlgmr.msra.gmra.mrb[0].mxu1 %vm68_vm0, %v727_v5 }
   0xb   :  { %695 = vmatpush3.bf16.msra.mxu1 %v728_v6 }
   0xc   :  { %696 = vmatprep.subr.bf16.mxu1 %v729_v7 }
   0xf   :  { %697 = vmatpush3.bf16.msra.mxu1 %v729_v7 }
  0xdd   :  { %v688_v9 = vpop.f32.mrb[0].mxu0  ;;  %v692_v11 = vpop.f32.mrb[0].mxu1 }
  0xde   :  { %v155_v12 = vmul.f32 %v688_v9, %v641_v8  ;;  %v159_v13 = vmul.f32 %v692_v11, %v641_v8  ;;  %v115_v14 = vpop.f32.mrb[1].mxu0  ;;  %v131_v15 = vpop.f32.mrb[1].mxu1 }
  0xdf   :  { %v153_v16 = vmul.f32 %v641_v8, %v115_v14  ;;  %v157_v17 = vmul.f32 %v641_v8, %v131_v15  ;;  %v689_v18 = vpop.f32.mrb[2].mxu0  ;;  %v693_v19 = vpop.f32.mrb[2].mxu1 }
  0xe0   :  { %v865_v20 = vadd.f32 %v642_v10, %v155_v12  ;;  %v867_v21 = vadd.f32 %v642_v10, %v159_v13  ;;  %v156_v22 = vmul.f32 %v689_v18, %v641_v8  ;;  %v160_v23 = vmul.f32 %v693_v19, %v641_v8  ;;  %v118_v24 = vpop.f32.mrb[3].mxu0  ;;  %v134_v25 = vpop.f32.mrb[3].mxu1 }
  0xe1   :  { %v869_v26 = vadd.f32 %v642_v10, %v153_v16  ;;  %v871_v27 = vadd.f32 %v642_v10, %v157_v17  ;;  %v154_v28 = vmul.f32 %v641_v8, %v118_v24  ;;  %v158_v29 = vmul.f32 %v641_v8, %v134_v25 }
  0xe2   :  { %v188_v30 = vmul.f32 1.442695, %v865_v20  ;;  %v196_v31 = vmul.f32 1.442695, %v867_v21  ;;  %v877_v34 = vadd.f32 %v642_v10, %v156_v22  ;;  %v879_v35 = vadd.f32 %v642_v10, %v160_v23 }
  0xe3   :  { %v184_v32 = vmul.f32 1.442695, %v869_v26  ;;  %v192_v33 = vmul.f32 1.442695, %v871_v27  ;;  %v881_v36 = vadd.f32 %v642_v10, %v154_v28  ;;  %v883_v37 = vadd.f32 %v642_v10, %v158_v29 }
  0xe4   :  { %732 = vpow2.f32 %v188_v30  ;;  %v190_v38 = vmul.f32 1.442695, %v877_v34  ;;  %v198_v39 = vmul.f32 1.442695, %v879_v35  ;;  %vm178_vm2 = vcmp.gt.f32.partialorder %v865_v20, 20.0 }
  0xe5   :  { %734 = vpow2.f32 %v196_v31  ;;  %v186_v40 = vmul.f32 1.442695, %v881_v36  ;;  %v194_v41 = vmul.f32 1.442695, %v883_v37  ;;  %vm179_vm3 = vcmp.gt.f32.partialorder %v877_v34, 20.0 }
  0xe6   :  { %736 = vpow2.f32 %v184_v32  ;;  %vm182_vm4 = vcmp.gt.f32.partialorder %v867_v21, 20.0  ;;  %vm183_vm6 = vcmp.gt.f32.partialorder %v879_v35, 20.0  ;;  %vm176_vm7 = vcmp.gt.f32.partialorder %v869_v26, 20.0 }
  0xe7   :  { %738 = vpow2.f32 %v192_v33  ;;  %vm177_vm9 = vcmp.gt.f32.partialorder %v881_v36, 20.0  ;;  %vm180_vm15 = vcmp.gt.f32.partialorder %v871_v27, 20.0 }
  0xe8   :  { %740 = vpow2.f32 %v190_v38 }
  0xe9   :  { %742 = vpow2.f32 %v198_v39 }
  0xea   :  { %744 = vpow2.f32 %v186_v40 }
  0xeb   :  { %746 = vpow2.f32 %v194_v41 }
  0xee   :  { %v733_v42 = vpop.eup %732 }
  0xef   :  { %v735_v43 = vpop.eup %734  ;;  %v218_v44 = vadd.f32 1.0, %v733_v42  ;;  %v221_v54 = vmul.f32 -0.5, %v733_v42  ;;  %v224_v56 = vand.u32 2147483647, %v733_v42 }
  0xf0   :  { %v737_v45 = vpop.eup %736  ;;  %v254_v46 = vadd.f32 1.0, %v735_v43  ;;  %v257_v57 = vmul.f32 -0.5, %v735_v43  ;;  %v260_v61 = vand.u32 2147483647, %v735_v43 }
  0xf1   :  { %v739_v47 = vpop.eup %738  ;;  %748 = vlog2.f32 %v218_v44  ;;  %v200_v48 = vadd.f32 1.0, %v737_v45  ;;  %v203_v59 = vmul.f32 -0.5, %v737_v45  ;;  %v222_v0 = vadd.f32 1.0, %v221_v54 }
  0xf2   :  { %v741_v49 = vpop.eup %740  ;;  %750 = vlog2.f32 %v254_v46  ;;  %v236_v50 = vadd.f32 1.0, %v739_v47  ;;  %v239_v62 = vmul.f32 -0.5, %v739_v47  ;;  %vm898_vm1 = vcmp.lt.f32.partialorder %v224_v56, 0.0004427343 }
  0xf3   :  { %v889_v51 = vpop.eup %742  ;;  %752 = vlog2.f32 %v200_v48  ;;  %v227_v53 = vadd.f32 1.0, %v741_v49  ;;  %v230_v63 = vmul.f32 -0.5, %v741_v49  ;;  %v258_v4 = vadd.f32 1.0, %v257_v57 }
  0xf4   :  { %v891_v52 = vpop.eup %744  ;;  %754 = vlog2.f32 %v236_v50  ;;  %v263_v58 = vadd.f32 1.0, %v889_v51  ;;  %v206_v5 = vand.u32 2147483647, %v737_v45  ;;  %v266_v6 = vmul.f32 -0.5, %v889_v51 }
  0xf5   :  { %v893_v55 = vpop.eup %746  ;;  %756 = vlog2.f32 %v227_v53  ;;  %v209_v60 = vadd.f32 1.0, %v891_v52  ;;  %v204_v8 = vadd.f32 1.0, %v203_v59  ;;  %v242_v9 = vand.u32 2147483647, %v739_v47 }
  0xf6   :  { %758 = vlog2.f32 %v263_v58  ;;  %v245_v1 = vadd.f32 1.0, %v893_v55  ;;  %v212_v10 = vmul.f32 -0.5, %v891_v52  ;;  %vm907_vm5 = vcmp.lt.f32.partialorder %v260_v61, 0.0004427343 }
  0xf7   :  { %760 = vlog2.f32 %v209_v60  ;;  %v240_v12 = vadd.f32 1.0, %v239_v62  ;;  %v231_v13 = vadd.f32 1.0, %v230_v63  ;;  %v233_v14 = vand.u32 2147483647, %v741_v49 }
  0xf8   :  { %762 = vlog2.f32 %v245_v1  ;;  %v223_v17 = vmul.f32 %v733_v42, %v222_v0  ;;  %v269_v18 = vand.u32 2147483647, %v889_v51  ;;  %v248_v19 = vmul.f32 -0.5, %v893_v55 }
  0xf9   :  { %v259_v23 = vmul.f32 %v735_v43, %v258_v4  ;;  %vm915_vm8 = vcmp.lt.f32.partialorder %v206_v5, 0.0004427343  ;;  %v267_v25 = vadd.f32 1.0, %v266_v6  ;;  %v205_v29 = vmul.f32 %v737_v45, %v204_v8 }
  0xfa   :  { %vm920_vm10 = vcmp.lt.f32.partialorder %v242_v9, 0.0004427343  ;;  %v213_v31 = vadd.f32 1.0, %v212_v10  ;;  %v215_v32 = vand.u32 2147483647, %v891_v52  ;;  %v241_v39 = vmul.f32 %v739_v47, %v240_v12 }
  0xfb   :  { %v749_v2 = vpop.eup %748  ;;  %v232_v40 = vmul.f32 %v741_v49, %v231_v13  ;;  %vm925_vm11 = vcmp.lt.f32.partialorder %v233_v14, 0.0004427343  ;;  %vm931_vm12 = vcmp.lt.f32.partialorder %v269_v18, 0.0004427343  ;;  %v249_v45 = vadd.f32 1.0, %v248_v19 }
  0xfc   :  { %v751_v7 = vpop.eup %750  ;;  %v220_v16 = vmul.f32 0.6931472, %v749_v2  ;;  %v268_v47 = vmul.f32 %v889_v51, %v267_v25  ;;  %v251_v49 = vand.u32 2147483647, %v893_v55  ;;  %v214_v57 = vmul.f32 %v891_v52, %v213_v31  ;;  %v656_v9 = vld [vmem:[%s1131_s3 + $0x1] ss:$0 sm:$0xff] }
  0xfd   :  { %v753_v15 = vpop.eup %752  ;;  %v256_v22 = vmul.f32 0.6931472, %v751_v7  ;;  %vm942_vm13 = vcmp.lt.f32.partialorder %v215_v32, 0.0004427343  ;;  %v250_v1 = vmul.f32 %v893_v55, %v249_v45 }
  0xfe   :  { %v755_v28 = vpop.eup %754  ;;  %v202_v38 = vmul.f32 0.6931472, %v753_v15  ;;  %v226_v42 = vsel %vm898_vm1, %v223_v17, %v220_v16  ;;  %vm252_vm14 = vcmp.lt.f32.partialorder %v251_v49, 0.0004427343  ;;  %vm181_vm1 = vcmp.gt.f32.partialorder %v883_v37, 20.0 }
  0xff   :  { %v757_v33 = vpop.eup %756  ;;  %v262_v48 = vsel %vm907_vm5, %v259_v23, %v256_v22  ;;  %v238_v50 = vmul.f32 0.6931472, %v755_v28  ;;  %v274_v59 = vsel %vm178_vm2, %v865_v20, %v226_v42 }
 0x100   :  { %v229_v43 = vmul.f32 0.6931472, %v757_v33  ;;  %v759_v46 = vpop.eup %758  ;;  %v208_v51 = vsel %vm915_vm8, %v205_v29, %v202_v38  ;;  %v278_v52 = vsel %vm182_vm4, %v867_v21, %v262_v48 }
 0x101   :  { %v761_v53 = vpop.eup %760  ;;  %v265_v56 = vmul.f32 0.6931472, %v759_v46  ;;  %v244_v20 = vsel %vm920_vm10, %v241_v39, %v238_v50  ;;  %v272_v21 = vsel %vm176_vm7, %v869_v26, %v208_v51  ;;  %v730_v26 = vld [vmem:[%s1132_s4] sm:$0xff]  }
 0x102   :  { %v235_v54 = vsel %vm925_vm11, %v232_v40, %v229_v43  ;;  %v211_v61 = vmul.f32 0.6931472, %v761_v53  ;;  %v763_v62 = vpop.eup %762  ;;  %v276_v6 = vsel %vm180_vm15, %v871_v27, %v244_v20  ;;  %706 = vmatprep.subr.bf16.mxu0 %v730_v26  ;;  %v731_v27 = vld [vmem:[%s1132_s4 + $0x8] sm:$0xff]  }
 0x103   :  { %v275_v60 = vsel %vm179_vm3, %v877_v34, %v235_v54  ;;  %v271_v0 = vsel %vm931_vm12, %v268_v47, %v265_v56  ;;  %v247_v3 = vmul.f32 0.6931472, %v763_v62  ;;  %707 = vmatpush3.bf16.msra.mxu0 %v730_v26 }
 0x104   :  { %v281_v63 = vpack.c.bf16 %v275_v60, %v274_v59  ;;  %v279_v2 = vsel %vm183_vm6, %v879_v35, %v271_v0  ;;  %v217_v34 = vsel %vm942_vm13, %v214_v57, %v211_v61  ;;  %708 = vmatprep.subr.bf16.mxu0 %v731_v27 }
 0x105   :  { %v273_v4 = vsel %vm177_vm9, %v881_v36, %v217_v34  ;;  %v283_v55 = vpack.c.bf16 %v279_v2, %v278_v52  ;;  %v253_v5 = vsel %vm252_vm14, %v250_v1, %v247_v3  ;;  %v654_v36 = vld [vmem:[%s1130_s2 + $0x1] ss:$0 sm:$0xff] }
 0x106   :  { %v280_v35 = vpack.c.bf16 %v273_v4, %v272_v21  ;;  %v277_v7 = vsel %vm181_vm1, %v883_v37, %v253_v5 }
 0x107   :  { %v282_v8 = vpack.c.bf16 %v277_v7, %v276_v6  ;;  %709 = vmatpush3.bf16.msra.mxu0 %v731_v27 }
 0x108   :  { %698 = vmatprep.mubr.msk.bf16.mxu1 %vm68_vm0, %v280_v35 }
 0x109   :  { %699 = vmatmul.mubr.msk.bf16.vlgmr.msra.gmra.mrb[4].mxu1 %vm68_vm0, %v281_v63 }
 0x10a   :  { %702 = vmatprep.mubr.msk.bf16.mxu1 %vm68_vm0, %v282_v8 }
 0x111   :  { %703 = vmatmul.mubr.msk.bf16.gmra.mrb[8].mxu1 %vm68_vm0, %v283_v55 }
 0x1dc   :  { %v700_v37 = vpop.f32.mrb[4].mxu1 }
 0x1dd   :  { %v388_v10 = vmul.f32 %v700_v37, %v654_v36  ;;  %v347_v11 = vpop.f32.mrb[5].mxu1 }
 0x1de   :  { %v386_v12 = vmul.f32 %v654_v36, %v347_v11  ;;  %v701_v13 = vpop.f32.mrb[6].mxu1 }
 0x1df   :  { %v993_v14 = vadd.f32 %v656_v9, %v388_v10  ;;  %v389_v15 = vmul.f32 %v701_v13, %v654_v36  ;;  %v350_v16 = vpop.f32.mrb[7].mxu1 }
 0x1e0   :  { %v995_v17 = vadd.f32 %v656_v9, %v386_v12  ;;  %v387_v18 = vmul.f32 %v654_v36, %v350_v16 }
 0x1e1   :  { %v422_v19 = vmul.f32 1.442695, %v993_v14  ;;  %v998_v22 = vadd.f32 %v656_v9, %v389_v15  ;;  %vm412_vm2 = vcmp.gt.f32.partialorder %v993_v14, 20.0 }
 0x1e2   :  { %v418_v23 = vmul.f32 1.442695, %v995_v17  ;;  %v1001_v24 = vadd.f32 %v656_v9, %v387_v18  ;;  %vm410_vm4 = vcmp.gt.f32.partialorder %v995_v17, 20.0 }
 0x1e3   :  { %764 = vpow2.f32 %v422_v19  ;;  %v424_v25 = vmul.f32 1.442695, %v998_v22  ;;  %vm413_vm3 = vcmp.gt.f32.partialorder %v998_v22, 20.0 }
 0x1e4   :  { %766 = vpow2.f32 %v418_v23  ;;  %v420_v28 = vmul.f32 1.442695, %v1001_v24  ;;  %v704_v29 = vpop.f32.mrb[8].mxu1  ;;  %vm411_vm5 = vcmp.gt.f32.partialorder %v1001_v24, 20.0 }
 0x1e5   :  { %768 = vpow2.f32 %v424_v25  ;;  %v392_v30 = vmul.f32 %v704_v29, %v654_v36  ;;  %v363_v31 = vpop.f32.mrb[9].mxu1 }
 0x1e6   :  { %770 = vpow2.f32 %v420_v28  ;;  %v390_v32 = vmul.f32 %v654_v36, %v363_v31  ;;  %v705_v33 = vpop.f32.mrb[10].mxu1 }
 0x1e7   :  { %v1005_v38 = vadd.f32 %v656_v9, %v392_v30  ;;  %v393_v39 = vmul.f32 %v705_v33, %v654_v36  ;;  %v366_v40 = vpop.f32.mrb[11].mxu1 }
 0x1e8   :  { %v1007_v41 = vadd.f32 %v656_v9, %v390_v32  ;;  %v391_v42 = vmul.f32 %v654_v36, %v366_v40 }
 0x1e9   :  { %v430_v43 = vmul.f32 1.442695, %v1005_v38  ;;  %v1010_v44 = vadd.f32 %v656_v9, %v393_v39  ;;  %vm416_vm11 = vcmp.gt.f32.partialorder %v1005_v38, 20.0 }
 0x1ea   :  { %v426_v45 = vmul.f32 1.442695, %v1007_v41  ;;  %v1013_v46 = vadd.f32 %v656_v9, %v391_v42  ;;  %vm414_vm1 = vcmp.gt.f32.partialorder %v1007_v41, 20.0 }
 0x1eb   :  { %772 = vpow2.f32 %v430_v43  ;;  %v432_v48 = vmul.f32 1.442695, %v1010_v44  ;;  %vm417_vm13 = vcmp.gt.f32.partialorder %v1010_v44, 20.0 }
 0x1ec   :  { %774 = vpow2.f32 %v426_v45  ;;  %v428_v50 = vmul.f32 1.442695, %v1013_v46 }
 0x1ed   :  { %v765_v47 = vpop.eup %764  ;;  %776 = vpow2.f32 %v432_v48 }
 0x1ee   :  { %v767_v49 = vpop.eup %766  ;;  %v452_v53 = vadd.f32 1.0, %v765_v47  ;;  %778 = vpow2.f32 %v428_v50  ;;  %v455_v51 = vmul.f32 -0.5, %v765_v47  ;;  %v458_v2 = vand.u32 2147483647, %v765_v47 }
 0x1ef   :  { %v769_v54 = vpop.eup %768  ;;  %v434_v56 = vadd.f32 1.0, %v767_v49  ;;  %v437_v60 = vmul.f32 -0.5, %v767_v49  ;;  %v440_v5 = vand.u32 2147483647, %v767_v49 }
 0x1f0   :  { %v771_v57 = vpop.eup %770  ;;  %780 = vlog2.f32 %v452_v53  ;;  %v461_v58 = vadd.f32 1.0, %v769_v54  ;;  %v464_v61 = vmul.f32 -0.5, %v769_v54  ;;  %v456_v20 = vadd.f32 1.0, %v455_v51 }
 0x1f1   :  { %782 = vlog2.f32 %v434_v56  ;;  %v443_v59 = vadd.f32 1.0, %v771_v57  ;;  %v446_v63 = vmul.f32 -0.5, %v771_v57  ;;  %v438_v34 = vadd.f32 1.0, %v437_v60 }
 0x1f2   :  { %784 = vlog2.f32 %v461_v58  ;;  %v465_v4 = vadd.f32 1.0, %v464_v61  ;;  %v467_v35 = vand.u32 2147483647, %v769_v54  ;;  %v457_v37 = vmul.f32 %v765_v47, %v456_v20 }
 0x1f3   :  { %786 = vlog2.f32 %v443_v59  ;;  %v447_v7 = vadd.f32 1.0, %v446_v63  ;;  %vm1034_vm6 = vcmp.lt.f32.partialorder %v458_v2, 0.0004427343  ;;  %v439_v10 = vmul.f32 %v767_v49, %v438_v34 }
 0x1f4   :  { %v466_v13 = vmul.f32 %v769_v54, %v465_v4  ;;  %v449_v15 = vand.u32 2147483647, %v771_v57  ;;  %vm1042_vm7 = vcmp.lt.f32.partialorder %v440_v5, 0.0004427343  ;;  %vm468_vm8 = vcmp.lt.f32.partialorder %v467_v35, 0.0004427343 }
 0x1f5   :  { %v1017_v62 = vpop.eup %772  ;;  %v448_v29 = vmul.f32 %v771_v57, %v447_v7 }
 0x1f6   :  { %v1019_v52 = vpop.eup %774  ;;  %v488_v0 = vadd.f32 1.0, %v1017_v62  ;;  %v491_v8 = vmul.f32 -0.5, %v1017_v62  ;;  %vm450_vm9 = vcmp.lt.f32.partialorder %v449_v15, 0.0004427343  ;;  %v494_v43 = vand.u32 2147483647, %v1017_v62 }
 0x1f7   :  { %v1022_v1 = vpop.eup %776  ;;  %v470_v3 = vadd.f32 1.0, %v1019_v52  ;;  %v473_v19 = vmul.f32 -0.5, %v1019_v52  ;;  %v476_v54 = vand.u32 2147483647, %v1019_v52 }
 0x1f8   :  { %v1026_v21 = vpop.eup %778  ;;  %788 = vlog2.f32 %v488_v0  ;;  %v497_v55 = vadd.f32 1.0, %v1022_v1  ;;  %v500_v23 = vmul.f32 -0.5, %v1022_v1  ;;  %v492_v30 = vadd.f32 1.0, %v491_v8 }
 0x1f9   :  { %790 = vlog2.f32 %v470_v3  ;;  %v479_v26 = vadd.f32 1.0, %v1026_v21  ;;  %v482_v39 = vmul.f32 -0.5, %v1026_v21  ;;  %v474_v50 = vadd.f32 1.0, %v473_v19 }
 0x1fa   :  { %v781_v6 = vpop.eup %780  ;;  %792 = vlog2.f32 %v497_v55  ;;  %v501_v47 = vadd.f32 1.0, %v500_v23  ;;  %v493_v58 = vmul.f32 %v1017_v62, %v492_v30  ;;  %vm1065_vm10 = vcmp.lt.f32.partialorder %v494_v43, 0.0004427343 }
 0x1fb   :  { %v783_v27 = vpop.eup %782  ;;  %v454_v36 = vmul.f32 0.6931472, %v781_v6  ;;  %794 = vlog2.f32 %v479_v26  ;;  %v483_v59 = vadd.f32 1.0, %v482_v39  ;;  %v485_v63 = vand.u32 2147483647, %v1026_v21 }
 0x1fc   :  { %v785_v11 = vpop.eup %784  ;;  %v436_v12 = vmul.f32 0.6931472, %v783_v27  ;;  %v475_v0 = vmul.f32 %v1019_v52, %v474_v50  ;;  %v502_v2 = vmul.f32 %v1022_v1, %v501_v47  ;;  %vm1076_vm12 = vcmp.lt.f32.partialorder %v476_v54, 0.0004427343 }
 0x1fd   :  { %v460_v16 = vsel %vm1034_vm6, %v457_v37, %v454_v36  ;;  %v463_v18 = vmul.f32 0.6931472, %v785_v11  ;;  %v787_v25 = vpop.eup %786  ;;  %vm486_vm15 = vcmp.lt.f32.partialorder %v485_v63, 0.0004427343 }
 0x1fe   :  { %v442_v31 = vsel %vm1042_vm7, %v439_v10, %v436_v12  ;;  %v445_v33 = vmul.f32 0.6931472, %v787_v25  ;;  %v508_v40 = vsel %vm412_vm2, %v993_v14, %v460_v16  ;;  %vm415_vm2 = vcmp.gt.f32.partialorder %v1013_v46, 20.0 }
 0x1ff   :  { %v469_v32 = vsel %vm468_vm8, %v466_v13, %v463_v18  ;;  %v506_v53 = vsel %vm410_vm4, %v995_v17, %v442_v31 }
 0x200   :  { %v509_v42 = vsel %vm413_vm3, %v998_v22, %v469_v32  ;;  %v451_v48 = vsel %vm450_vm9, %v448_v29, %v445_v33  ;;  %v503_v22 = vand.u32 2147483647, %v1022_v1  ;;  %v484_v1 = vmul.f32 %v1026_v21, %v483_v59 }
 0x201   :  { %v515_v45 = vpack.c.bf16 %v509_v42, %v508_v40  ;;  %v507_v14 = vsel %vm411_vm5, %v1001_v24, %v451_v48  ;;  %vm618_vm3 = vcmask 64512  }
 0x202   :  { %v789_v49 = vpop.eup %788  ;;  %v514_v51 = vpack.c.bf16 %v507_v14, %v506_v53  ;;  %vm504_vm14 = vcmp.lt.f32.partialorder %v503_v22, 0.0004427343 }
 0x203   :  { %v791_v56 = vpop.eup %790  ;;  %v490_v57 = vmul.f32 0.6931472, %v789_v49 }
 0x204   :  { %v793_v60 = vpop.eup %792  ;;  %v472_v17 = vmul.f32 0.6931472, %v791_v56  ;;  %710 = vmatprep.mubr.msk.bf16.mxu0 %vm68_vm0, %v514_v51 }
 0x205   :  { %v496_v24 = vsel %vm1065_vm10, %v493_v58, %v490_v57  ;;  %v499_v20 = vmul.f32 0.6931472, %v793_v60  ;;  %v795_v62 = vpop.eup %794  ;;  %711 = vmatmul.mubr.msk.bf16.vlgmr.msra.gmra.mrb[4].mxu0 %vm68_vm0, %v515_v45 }
 0x206   :  { %v478_v52 = vsel %vm1076_vm12, %v475_v0, %v472_v17  ;;  %v481_v4 = vmul.f32 0.6931472, %v795_v62  ;;  %v512_v55 = vsel %vm416_vm11, %v1005_v38, %v496_v24  ;;  %v657_v38 = vld [vmem:[%s1133_s5] ss:$0 sm:$0xff] }
 0x207   :  { %v505_v3 = vsel %vm504_vm14, %v502_v2, %v499_v20  ;;  %v510_v7 = vsel %vm414_vm1, %v1007_v41, %v478_v52 }
 0x208   :  { %v513_v5 = vsel %vm417_vm13, %v1010_v44, %v505_v3  ;;  %v487_v35 = vsel %vm486_vm15, %v484_v1, %v481_v4 }
 0x209   :  { %v517_v6 = vpack.c.bf16 %v513_v5, %v512_v55  ;;  %v511_v8 = vsel %vm415_vm2, %v1013_v46, %v487_v35 }
 0x20a   :  { %v516_v26 = vpack.c.bf16 %v511_v8, %v510_v7 }
 0x20c   :  { %714 = vmatprep.mubr.msk.bf16.mxu0 %vm68_vm0, %v516_v26 }
 0x20d   :  { %715 = vmatmul.mubr.msk.bf16.gmra.mrb[8].mxu0 %vm68_vm0, %v517_v6 }
 0x2d8   :  { %v712_v44 = vpop.f32.mrb[4].mxu0 }
 0x2d9   :  { %v596_v21 = vadd.f32 %v712_v44, %v657_v38  ;;  %v587_v27 = vpop.f32.mrb[5].mxu0 }
 0x2da   :  { %v588_v36 = vadd.f32 %v657_v38, %v587_v27  ;;  %v713_v37 = vpop.f32.mrb[6].mxu0 }
 0x2db   :  { %621 = vst.msk [vmem:[%s1134_s6 + $0x10] sm:$0xff] %vm618_vm3, %v596_v21  ;;  %v599_v41 = vadd.f32 %v713_v37, %v657_v38  ;;  %v590_v46 = vpop.f32.mrb[7].mxu0 }
 0x2dc   :  { %619 = vst.msk [vmem:[%s1134_s6] sm:$0xff] %vm618_vm3, %v588_v36  ;;  %v591_v9 = vadd.f32 %v657_v38, %v590_v46 }
 0x2dd   :  { %622 = vst.msk [vmem:[%s1134_s6 + $0x18] sm:$0xff] %vm618_vm3, %v599_v41 }
 0x2de   :  { %620 = vst.msk [vmem:[%s1134_s6 + $0x8] sm:$0xff] %vm618_vm3, %v591_v9 }
 0x2e0   :  { %v716_v10 = vpop.f32.mrb[8].mxu0 }
 0x2e1   :  { %v612_v11 = vadd.f32 %v716_v10, %v657_v38  ;;  %v603_v12 = vpop.f32.mrb[9].mxu0 }
 0x2e2   :  { %v604_v13 = vadd.f32 %v657_v38, %v603_v12  ;;  %v717_v15 = vpop.f32.mrb[10].mxu0 }
 0x2e3   :  { %625 = vst.msk [vmem:[%s1134_s6 + $0x30] sm:$0xff] %vm618_vm3, %v612_v11  ;;  %v615_v16 = vadd.f32 %v717_v15, %v657_v38  ;;  %v606_v18 = vpop.f32.mrb[11].mxu0 }
 0x2e4   :  { %623 = vst.msk [vmem:[%s1134_s6 + $0x20] sm:$0xff] %vm618_vm3, %v604_v13  ;;  %v607_v19 = vadd.f32 %v657_v38, %v606_v18 }
 0x2e5   :  { %626 = vst.msk [vmem:[%s1134_s6 + $0x38] sm:$0xff] %vm618_vm3, %v615_v16 }
 0x2e6   :  { %624 = vst.msk [vmem:[%s1134_s6 + $0x28] sm:$0xff] %vm618_vm3, %v607_v19 }

</bundles_post_ra>
